<compile_context>
chip_gen: v7x
topology: tpu7x:2x2x1
jax: 0.10.0
libtpu: 0.0.40
codegen_flags: <defaults>
</compile_context>

<pallas_src>
import functools

import jax
import jax.numpy as jnp
from jax.experimental import pallas as pl
from jax.experimental.pallas import tpu as pltpu


# ----------------------------- Pallas kernels -------------------------------

def _xw_kernel(src_idx_ref, x_ref, w_ref, o_ref):
    """XW[slot, m-tile] = X[src(slot), m-tile] @ W[slot]  (bf16 in, bf16 out)."""
    del src_idx_ref  # consumed by the BlockSpec index_maps only
    o_ref[...] = jnp.dot(
        x_ref[...], w_ref[...], preferred_element_type=jnp.float32
    ).astype(o_ref.dtype)


def _agg_kernel(rel_off_ref, nrels_ref, a_ref, xw_ref, b_ref, o_ref, acc_ref,
                *, apply_relu):
    """out[d, m-tile] = relu( sum_r A[slot(d,r), m-tile] @ XW[slot(d,r)] + b[d] ).

    grid = (dst_types, node_tiles, rmax); relation axis last (reduction).
    Ragged tail steps (r >= nrels[d]) are skipped (their block indices are
    clamped in the index_maps so no new DMA is issued either).
    """
    d = pl.program_id(0)
    r = pl.program_id(2)
    nr = pl.num_programs(2)

    @pl.when(r == 0)
    def _():
        acc_ref[...] = jnp.zeros_like(acc_ref)

    @pl.when(r < nrels_ref[d])
    def _():
        acc_ref[...] += jnp.dot(
            a_ref[...], xw_ref[...], preferred_element_type=jnp.float32
        )

    @pl.when(r == nr - 1)
    def _():
        out = acc_ref[...] + b_ref[...]          # b is the per-dst summed bias
        if apply_relu:
            out = jnp.maximum(out, 0.0)
        o_ref[...] = out.astype(o_ref.dtype)


# ------------------------------ kernel wrappers ------------------------------

_VMEM_LIMIT = 64 * 1024 * 1024


def xw_precompute(src_idx, x_all, w_pack, tile_m):
    """(R, NP, FP) bf16 : per-relation-slot X[src] @ W."""
    _, np_, fp = x_all.shape
    r = w_pack.shape[0]
    return pl.pallas_call(
        _xw_kernel,
        out_shape=jax.ShapeDtypeStruct((r, np_, fp), jnp.bfloat16),
        grid_spec=pltpu.PrefetchScalarGridSpec(
            num_scalar_prefetch=1,
            grid=(r, np_ // tile_m),
            in_specs=[
                pl.BlockSpec((None, tile_m, fp), lambda s, m, si: (si[s], m, 0)),
                pl.BlockSpec((None, fp, fp), lambda s, m, si: (s, 0, 0)),
            ],
            out_specs=pl.BlockSpec((None, tile_m, fp),
                                   lambda s, m, si: (s, m, 0)),
        ),
        compiler_params=pltpu.CompilerParams(
            dimension_semantics=("parallel", "parallel"),
            vmem_limit_bytes=_VMEM_LIMIT,
        ),
    )(src_idx, x_all, w_pack)


def aggregate_relations(rel_off, nrels, a_pack, xw_pack, b_sum, rmax,
                        apply_relu, tile_m):
    """(T, NP, FP) bf16 : sum_r A @ XW + bias_sum (+ ReLU) per dst type."""
    t = b_sum.shape[0]
    np_ = a_pack.shape[1]
    fp = xw_pack.shape[2]
    kernel = functools.partial(_agg_kernel, apply_relu=apply_relu)

    def slot_of(d, r, rel_off_ref, nrels_ref):
        # Clamp ragged-tail steps to the previous real slot: block index is
        # unchanged -> Pallas skips the (all-wasted) A / XW DMA.
        return rel_off_ref[d] + jnp.minimum(r, jnp.maximum(nrels_ref[d] - 1, 0))

    return pl.pallas_call(
        kernel,
        out_shape=jax.ShapeDtypeStruct((t, np_, fp), jnp.bfloat16),
        grid_spec=pltpu.PrefetchScalarGridSpec(
            num_scalar_prefetch=2,
            grid=(t, np_ // tile_m, rmax),
            in_specs=[
                pl.BlockSpec((None, tile_m, np_),
                             lambda d, m, r, ro, nr: (slot_of(d, r, ro, nr), m, 0)),
                pl.BlockSpec((None, np_, fp),
                             lambda d, m, r, ro, nr: (slot_of(d, r, ro, nr), 0, 0)),
                pl.BlockSpec((None, 1, fp),
                             lambda d, m, r, ro, nr: (d, 0, 0)),
            ],
            out_specs=pl.BlockSpec((None, tile_m, fp),
                                   lambda d, m, r, ro, nr: (d, m, 0)),
            scratch_shapes=[pltpu.VMEM((tile_m, fp), jnp.float32)],
        ),
        compiler_params=pltpu.CompilerParams(
            dimension_semantics=("parallel", "parallel", "arbitrary"),
            vmem_limit_bytes=_VMEM_LIMIT,
        ),
    )(rel_off, nrels, a_pack, xw_pack, b_sum)


def hetero_layer(sched, a_pack, x_all, w_pack, b_sum, apply_relu, tile_m):
    """One dglnn.HeteroGraphConv({rel: GraphConv}, aggregate='sum') layer."""
    src_idx, rel_off, nrels, rmax = sched
    xw = xw_precompute(src_idx, x_all, w_pack, tile_m)
    return aggregate_relations(rel_off, nrels, a_pack, xw, b_sum, rmax,
                               apply_relu, tile_m)


def rgcn_forward(sched, a_pack, x_all, layer_params, tile_m):
    """3-layer RGCN (ReLU after layers 1 & 2; dropout p=0 -> identity)."""
    h = hetero_layer(sched, a_pack, x_all, *layer_params[0],
                     apply_relu=True, tile_m=tile_m)
    h = hetero_layer(sched, a_pack, h, *layer_params[1],
                     apply_relu=True, tile_m=tile_m)
    h = hetero_layer(sched, a_pack, h, *layer_params[2],
                     apply_relu=False, tile_m=tile_m)
    return h


# --------------------------- packing utilities ------------------------------

def _round_up(x, m):
    return (x + m - 1) // m * m


def _pick_tile_m(np_, max_tile=512):
    """Largest multiple of 128 that divides np_ and is <= max_tile."""
    best, t = 128, 256
    while t <= min(max_tile, np_):
        if np_ % t == 0:
            best = t
        t += 128
    return min(best, np_)


def build_schedule(rel_names, ntypes):
    """Compact relation-slot schedule.

    Slots are grouped by dst type and, within a dst type, sorted by src type
    (so consecutive slots reuse the same X slab and its DMA is skipped).
    Returns (slots, src_idx (R,), rel_off (T,), nrels (T,), rmax).
    """
    t_idx = {t: i for i, t in enumerate(ntypes)}
    by_dst = {t: [] for t in ntypes}
    for (s, r, d) in rel_names:
        by_dst[d].append((s, r, d))
    for d in ntypes:
        by_dst[d].sort(key=lambda e: t_idx[e[0]])

    slots, rel_off, nrels = [], [], []
    for d in ntypes:
        rel_off.append(len(slots))
        nrels.append(len(by_dst[d]))
        slots.extend(by_dst[d])
    rmax = max(1, max(nrels))
    src_idx = jnp.array([t_idx[s] for (s, _, _) in slots], jnp.int32)
    return (slots, src_idx, jnp.array(rel_off, jnp.int32),
            jnp.array(nrels, jnp.int32), rmax)


def pack_adjacency(adjs, slots, np_):
    """(R, NP, NP) bf16 zero-padded normalized adjacencies."""
    a = jnp.zeros((len(slots), np_, np_), jnp.float32)
    for i, (_, r, _) in enumerate(slots):
        m = adjs[r]
        a = a.at[i, : m.shape[0], : m.shape[1]].set(m)
    return a.astype(jnp.bfloat16)


def pack_weights(weights, biases, slots, ntypes, fp):
    """(R, FP, FP) bf16 weights and (T, 1, FP) f32 per-dst summed biases."""
    t_idx = {t: i for i, t in enumerate(ntypes)}
    w = jnp.zeros((len(slots), fp, fp), jnp.float32)
    b = jnp.zeros((len(ntypes), 1, fp), jnp.float32)
    for i, (_, r, d) in enumerate(slots):
        wi, bi = weights[r], biases[r]
        w = w.at[i, : wi.shape[0], : wi.shape[1]].set(wi)
        b = b.at[t_idx[d], 0, : bi.shape[0]].add(bi)   # pre-summed per dst
    return w.astype(jnp.bfloat16), b


def pack_features(x, ntypes, np_, fp):
    """(T, NP, FP) bf16 zero-padded per-node-type features."""
    x_all = jnp.zeros((len(ntypes), np_, fp), jnp.float32)
    for ti, t in enumerate(ntypes):
        v = x[t]
        x_all = x_all.at[ti, : v.shape[0], : v.shape[1]].set(v)
    return x_all.astype(jnp.bfloat16)


# ------------------------------ reference (JAX) ------------------------------

def _ref_forward(adjs, x, params, rel_names):
    def layer(inputs, W, B, relu):
        out = {}
        for (s, r, d) in rel_names:
            c = adjs[r] @ (inputs[s] @ W[r]) + B[r][None, :]
            out[d] = out.get(d, 0.0) + c
        if relu:
            out = {k: jnp.maximum(v, 0.0) for k, v in out.items()}
        return out

    h = layer(x, params["w1"], params["b1"], True)
    h = layer(h, params["w2"], params["b2"], True)
    h = layer(h, params["w3"], params["b3"], False)
    return h


# ---------------------------------- main -------------------------------------

def _normalize(adj):
    """DGL GraphConv norm='both': D_in^{-1/2} A D_out^{-1/2}, degrees >= 1."""
    d_in = jnp.clip(adj.sum(axis=1), 1.0, None)    # (N_dst,)
    d_out = jnp.clip(adj.sum(axis=0), 1.0, None)   # (N_src,)
    return adj * (d_in[:, None] ** -0.5) * (d_out[None, :] ** -0.5)


if __name__ == "__main__":
    key = jax.random.PRNGKey(0)

    # Node types and relations (src_type, rel_name, dst_type)
    n_nodes = {"user": 16, "item": 24}
    in_feats = {"user": 8, "item": 12}
    hid_feats, out_feats = 16, 8
    rel_names = [
        ("user", "follows", "user"),
        ("user", "rates", "item"),
        ("item", "rated_by", "user"),
    ]
    ntypes = sorted(n_nodes)  # ["item", "user"]

    # Deterministic random bipartite adjacencies + symmetric normalization
    adjs = {}
    for i, (s, r, d) in enumerate(rel_names):
        k = jax.random.fold_in(key, 100 + i)
        a = jax.random.bernoulli(k, 0.3, (n_nodes[d], n_nodes[s])).astype(
            jnp.float32
        )
        adjs[r] = _normalize(a)

    # Deterministic parameters (xavier-ish scale)
    def make_w(k, fin, fout):
        return jax.random.normal(k, (fin, fout), jnp.float32) * (fin ** -0.5)

    params = {"w1": {}, "b1": {}, "w2": {}, "b2": {}, "w3": {}, "b3": {}}
    for i, (s, r, d) in enumerate(rel_names):
        params["w1"][r] = make_w(jax.random.fold_in(key, 200 + i),
                                 in_feats[s], hid_feats)
        params["b1"][r] = jnp.zeros((hid_feats,), jnp.float32) + 0.01 * (i + 1)
        params["w2"][r] = make_w(jax.random.fold_in(key, 300 + i),
                                 hid_feats, hid_feats)
        params["b2"][r] = jnp.zeros((hid_feats,), jnp.float32) + 0.02 * (i + 1)
        params["w3"][r] = make_w(jax.random.fold_in(key, 400 + i),
                                 hid_feats, out_feats)
        params["b3"][r] = jnp.zeros((out_feats,), jnp.float32) + 0.03 * (i + 1)

    # Input features per node type
    x = {
        nt: jax.random.normal(jax.random.fold_in(key, 500 + j),
                              (n_nodes[nt], in_feats[nt]), jnp.float32)
        for j, nt in enumerate(sorted(n_nodes))
    }

    # ---- lane-dense bf16 packing (done once, outside the hot path) ----
    NP = _round_up(max(n_nodes.values()), 128)   # node axis  -> 128
    FP = _round_up(max(list(in_feats.values()) + [hid_feats, out_feats]), 128)
    TILE_M = _pick_tile_m(NP)

    slots, src_idx, rel_off, nrels, rmax = build_schedule(rel_names, ntypes)
    sched = (src_idx, rel_off, nrels, rmax)
    a_pack = pack_adjacency(adjs, slots, NP)
    layer_params = [
        pack_weights(params["w1"], params["b1"], slots, ntypes, FP),
        pack_weights(params["w2"], params["b2"], slots, ntypes, FP),
        pack_weights(params["w3"], params["b3"], slots, ntypes, FP),
    ]
    x_all = pack_features(x, ntypes, NP, FP)

    # ---- fused Pallas forward (2 pallas_calls per layer) ----
    h_pad = rgcn_forward(sched, a_pack, x_all, layer_params, TILE_M)
    h_pad = jax.block_until_ready(h_pad)
    out = {
        nt: h_pad[ti, : n_nodes[nt], :out_feats].astype(jnp.float32)
        for ti, nt in enumerate(ntypes)
    }

    # ---- check against pure-JAX f32 reference ----
    # Tolerance is loosened vs. the previous f32 kernel because A/W/X and the
    # intermediate activations are stored/multiplied in bf16 (f32 accumulate).
    ref = _ref_forward(adjs, x, params, rel_names)
    for nt in out:
        assert out[nt].shape == (n_nodes[nt], out_feats), out[nt].shape
        assert jnp.allclose(out[nt], ref[nt], atol=5e-2, rtol=5e-2), nt

    print("KERNEL_OK")
</pallas_src>

<mosaic_0001>
module attributes {stable_mosaic.version = 11 : i64} {
  func.func @_xw_kernel(%arg0: i32, %arg1: i32, %arg2: memref<3xi32, #tpu.memory_space<smem>>, %arg3: memref<1x128x128xbf16, #tpu.memory_space<vmem>>, %arg4: memref<1x128x128xbf16, #tpu.memory_space<vmem>>, %arg5: memref<1x128x128xbf16, #tpu.memory_space<vmem>>) attributes {dimension_semantics = [#tpu.dimension_semantics<parallel>, #tpu.dimension_semantics<parallel>], iteration_bounds = array<i64: 3, 1>, scalar_prefetch = 1 : i64, scratch_operands = 0 : i64, tpu.core_type = #tpu.core_type<tc>, window_params = [{transform_indices = @transform_0, window_bounds = array<i64: 1, 128, 128>}, {transform_indices = @transform_1, window_bounds = array<i64: 1, 128, 128>}, {transform_indices = @transform_2, window_bounds = array<i64: 1, 128, 128>}]} {
    %c0 = arith.constant 0 : index
    %c0_0 = arith.constant 0 : index
    %c0_1 = arith.constant 0 : index
    %0 = vector.load %arg3[%c0, %c0_0, %c0_1] : memref<1x128x128xbf16, #tpu.memory_space<vmem>>, vector<1x128x128xbf16>
    %1 = vector.shape_cast %0 : vector<1x128x128xbf16> to vector<128x128xbf16>
    %c0_2 = arith.constant 0 : index
    %c0_3 = arith.constant 0 : index
    %c0_4 = arith.constant 0 : index
    %2 = vector.load %arg4[%c0_2, %c0_3, %c0_4] : memref<1x128x128xbf16, #tpu.memory_space<vmem>>, vector<1x128x128xbf16>
    %3 = vector.shape_cast %2 : vector<1x128x128xbf16> to vector<128x128xbf16>
    %cst = arith.constant dense<0.000000e+00> : vector<128x128xf32>
    %4 = tpu.matmul %1, %3, %cst {dimension_numbers = #tpu.dot_dimension_numbers<[1], [0], [0], [1], [0, 0, 1, 1], [], []>} : vector<128x128xbf16>, vector<128x128xbf16>, vector<128x128xf32> -> vector<128x128xf32>
    %5 = arith.truncf %4 : vector<128x128xf32> to vector<128x128xbf16>
    %c0_5 = arith.constant 0 : index
    %c0_6 = arith.constant 0 : index
    %c0_7 = arith.constant 0 : index
    %6 = vector.load %arg5[%c0_5, %c0_6, %c0_7] : memref<1x128x128xbf16, #tpu.memory_space<vmem>>, vector<1x128x128xbf16>
    %7 = vector.shape_cast %6 : vector<1x128x128xbf16> to vector<128x128xbf16>
    %8 = vector.shape_cast %5 : vector<128x128xbf16> to vector<1x128x128xbf16>
    tpu.vector_store %arg5[%c0_5, %c0_6, %c0_7], %8 {strides = array<i32>} : memref<1x128x128xbf16, #tpu.memory_space<vmem>>, vector<1x128x128xbf16>,
    return
  }
  func.func @transform_0(%arg0: i32, %arg1: i32, %arg2: memref<3xi32, #tpu.memory_space<smem>>) -> (i32, i32, i32) {
    %0 = arith.index_cast %arg0 : i32 to index
    %1 = memref.load %arg2[%0] : memref<3xi32, #tpu.memory_space<smem>>
    %c0_i32 = arith.constant 0 : i32
    %c0_i32_0 = arith.constant 0 : i32
    return %1, %arg1, %c0_i32 : i32, i32, i32
  }
  func.func @transform_1(%arg0: i32, %arg1: i32, %arg2: memref<3xi32, #tpu.memory_space<smem>>) -> (i32, i32, i32) {
    %c0_i32 = arith.constant 0 : i32
    %c0_i32_0 = arith.constant 0 : i32
    %c0_i32_1 = arith.constant 0 : i32
    return %arg0, %c0_i32, %c0_i32_0 : i32, i32, i32
  }
  func.func @transform_2(%arg0: i32, %arg1: i32, %arg2: memref<3xi32, #tpu.memory_space<smem>>) -> (i32, i32, i32) {
    %c0_i32 = arith.constant 0 : i32
    %c0_i32_0 = arith.constant 0 : i32
    return %arg0, %arg1, %c0_i32 : i32, i32, i32
  }
}

</mosaic_0001>

<bundles_post_ra>
// kernel: tpu_custom_call.1
= control target key start
LH: loop header
LB: loop body
LE: loop exit
PB: predicated region body
PF: predicated region fallthrough
CT: control target
= control target key end

     0   :  { %s1510_s0 = inlined_call_operand.hbm [shape: s32[3], index: 0, kind: input, shape index: {}]   ;;  %s1511_s1 = inlined_call_operand.hbm [shape: bf16[2,128,128], index: 1, kind: input, shape index: {}]   ;;  %s1512_s2 = inlined_call_operand.hbm [shape: bf16[3,128,128], index: 2, kind: input, shape index: {}]   ;;  %s1513_s3 = inlined_call_operand.hbm [shape: bf16[3,128,128], index: 3, kind: output, shape index: {}]  }
   0x1   :  { %s960_s14 = scalar_lea.hbm %s1510_s0, 16 }
   0x2   :  { %p961_p0 = scmp.ne.s32.totalorder %s1510_s0, %s960_s14  ;;  %p964_p1 = scmp.lt.u32.totalorder %s960_s14, %s1510_s0 }
   0x4   :  { %p966_p2 = pnand %p964_p1, %p961_p0 }
   0x6   :  { %969 = shalt.err (!%p966_p2)  }
   0x7   :  { %s1144_s19 = smov [#allocation3]  }
   0x8   :  { %9 = dma.hbm_to_smem %s1510_s0, 16, %s1144_s19, [#allocation2] }
   0x9   :  { %1094 = dma.done.wait [#allocation2], 16 }
   0xa   :  { %1095 = vsyncadd [#allocation2], 4294967280 }
   0xb   :  { %11 = sfence }
   0xc   :  { %12 = vsyncpa [#allocation5], 0 }
   0xd   :  { %14 = vsyncpa [#allocation5 + $0x1], 0 }
   0xe   :  { %15 = vsyncpa [#allocation8], 0 }
   0xf   :  { %17 = vsyncpa [#allocation8 + $0x1], 0 }
  0x10   :  { %18 = vsyncpa [#allocation6], 0 }
  0x11   :  { %20 = vsyncpa [#allocation6 + $0x1], 0  ;;  %s1184_s22 = smov 0   ;;  %s1186_s23 = smov 0  }
  0x12   :  { %s1188_s24 = smov 0   ;;  %s1190_s25 = smov 0  }
  0x13   :  { %s1192_s26 = smov 0   ;;  %s1194_s0 = smov 0  }
  0x14   :  { %s1196_s27 = smov 0   ;;  %s1198_s28 = smov 0  }
  0x15   :  { %s1200_s29 = smov 0  }
  0x16 LB: > { %s663_s30 = sadd.s32 4294967295, %s1142_s29   ;;  %s38_s4 = sadd.s32 1, %s1138_s28  ;;  %s1142_s29 = sphi %s1200_s29, %s26_s29   ;;  %s1138_s28 = sphi %s1198_s28, %s1545_s28   ;;  %s1134_s27 = sphi %s1196_s27, %s1544_s27   ;;  %s1130_s0 = sphi %s1194_s0, %s1543_s0   ;;  %s1126_s26 = sphi %s1192_s26, %s1542_s26   ;;  %s1122_s25 = sphi %s1190_s25, %s1541_s25   ;;  %s1118_s24 = sphi %s1188_s24, %s1540_s24   ;;  %s1114_s23 = sphi %s1186_s23, %s1539_s23   ;;  %s1110_s22 = sphi %s1184_s22, %s1538_s22  }
  0x17   : > { %p40_p3 = scmp.ge.s32.totalorder %s38_s4, 3  ;;  %s42_s5 = sld [smem:[#allocation3 + %s1138_s28]] }
  0x18   : > { %s49_s6 = sadd.s32 1, %s1130_s0  ;;  %p56_p4 = scmp.ne.s32.totalorder %s1130_s0, %s1126_s26 }
  0x19   : > { %s1547_s4 = smov (%p40_p3, %s38_s4), 0  ;;  %p1515_p5 = scmp.eq.s32.totalorder %s1142_s29, 0 }
  0x1a   : > { %p62_p6 = scmp.ne.s32.totalorder %s1126_s26, %s1122_s25  ;;  %s43_s7 = sld [smem:[#allocation3 + %s1547_s4]] }
  0x1b   : > { %p1240_p7 = scmp.eq.s32.totalorder %s663_s30, 0  ;;  %p1246_p8 = por %p1515_p5, %p56_p4 }
  0x1c   : > { %p1514_p10 = scmp.lt.s32.totalorder %s1142_s29, 3  ;;  %s140_s11 = sand.u32 1, %s1130_s0  }
  0x1d   : > { %s1520_s8 = scalar_select %p1240_p7, 1, 0 }
  0x1e   : > { %p1252_p9 = por %p1240_p7, %p62_p6  ;;  %s667_s12 = sshll.u32 %s140_s11, 6 }
  0x1f   : > { %p1262_p11 = pnand %p1514_p10, %p1246_p8  ;;  %s144_s15 = scalar_lea.vmem [#allocation4], %s667_s12 }
  0x20   : > { %s1522_s10 = scalar_select %p1252_p9, 1, 0 }
  0x21   : > { %s44_s14 = ssub.s32 %s42_s5, %s43_s7  ;;  %s154_s16 = sshll.u32 %s144_s15, 4  ;;  %s1266_s16 = int_to_ptr.vmem [resolvable:$true] %s154_s16 }
  0x22   : > { %p47_p12 = scmp.eq.s32.totalorder %s44_s14, 0  ;;  %p673_p13 = scmp.ge.s32.totalorder %s1142_s29, 1 }
  0x23   : > { %s844_s17 = scalar_select %p1246_p8, [#allocation3], [#allocation10] }
  0x24   : > { %s1271_s18 = scalar_select %p47_p12, %s1130_s0, %s49_s6  }
  0x25   : > { %s845_s19 = scalar_select %p1246_p8, %s1138_s28, 0 }
  0x26   : > { %s1549_s17 = smov (!%p1514_p10, %s844_s17), [#allocation11]  ;;  %p183_p0 = scmp.lt.s32.totalorder %s1142_s29, 4 }
  0x27   : > { %s1551_s19 = smov (!%p1514_p10, %s845_s19), 0  ;;  %s664_s25 = sadd.s32 4294967294, %s1142_s29  }
  0x28   : > { %s145_s20 = sld [smem:[%s1549_s17 + %s1551_s19]]  ;;  %p1282_p1 = pnand %p673_p13, %p183_p0 }
  0x29   : > { %s72_s5 = ssub.s32 %s1138_s28, %s1547_s4  ;;  %s75_s15 = sadd.s32 1, %s1118_s24 }
  0x2a   : > { %s1524_s21 = scalar_select %p1282_p1, 1, 0 }
  0x2b   : > { %p1289_p2 = scmp.eq.s32.totalorder %s72_s5, 0  ;;  %s1299_s17 = scalar_lea.sflag [#allocation5], %s140_s11 }
  0x2c   : > { %p972_p4 = pneg %p1262_p11 }
  0x2e   : > { %s714_s7 = sshll.u32 %s145_s20, 10 }
  0x2f   : > { %s1296_s14 = scalar_lea.hbm %s1511_s1, %s714_s7  ;;  %s975_s7 = scalar_lea.hbm %s1511_s1, 2048 }
  0x30   : > { %s970_s19 = scalar_lea.hbm %s1296_s14, 1024  ;;  %p976_p12 = scmp.lt.u32.totalorder %s1296_s14, %s1511_s1 }
  0x31   : > { %p971_p3 = scmp.ne.s32.totalorder %s1296_s14, %s970_s19  ;;  %p977_p13 = scmp.lt.u32.totalorder %s975_s7, %s970_s19 }
  0x32   : > { %p979_p10 = scmp.lt.u32.totalorder %s970_s19, %s1296_s14 }
  0x33   : > { %p973_p6 = pnand %p972_p4, %p971_p3  ;;  %p978_p0 = por %p977_p13, %p976_p12 }
  0x35   : > { %p974_p8 = pneg %p973_p6  ;;  %p980_p5 = por %p979_p10, %p978_p0 }
  0x37   : > { %p981_p9 = pnand %p980_p5, %p974_p8 }
  0x39   : > { %984 = shalt.err (!%p981_p9)
}
  0x3a   : > { %s985_s11 = scalar_lea.vmem %s1266_s16, 1024  ;;  %s1145_s20 = smov [#allocation4]  }
  0x3b   : > { %p986_p3 = scmp.ne.s32.totalorder %s1266_s16, %s985_s11  ;;  %s990_s5 = sshll.u32 %s1145_s20, 4  ;;  %s991_s5 = int_to_ptr.vmem [resolvable:$false] %s990_s5 }
  0x3c   : > { %s992_s9 = scalar_lea.vmem %s991_s5, 2048  ;;  %p993_p7 = scmp.lt.s32.totalorder %s1266_s16, %s991_s5 }
  0x3d   : > { %p988_p6 = pnand %p986_p3, %p972_p4  ;;  %p994_p12 = scmp.lt.s32.totalorder %s992_s9, %s985_s11 }
  0x3f   : > { %p989_p1 = pneg %p988_p6  ;;  %p995_p13 = por %p994_p12, %p993_p7 }
  0x41   : > { %p996_p10 = pnand %p995_p13, %p989_p1 }
  0x43   : > { %999 = shalt.err (!%p996_p10)
}
  0x44   : > { %s1518_s19 = smov 64   ;;  %s1147_s7 = smov 4  }
  0x45   : > { %857 = dma.hbm_to_vmem [thread:$0]  (!%p1262_p11), %s1296_s14, 1024, %s1266_s16, %s1299_s17, %s1518_s19, %s1518_s19, %s1147_s7  }
  0x46   : > { %s1335_s12 = scalar_select %p1289_p2, %s1118_s24, %s75_s15  }
  0x47   : > { %p82_p5 = scmp.ne.s32.totalorder %s1118_s24, %s1114_s23  ;;  %p88_p7 = scmp.ne.s32.totalorder %s1114_s23, %s1110_s22 }
  0x48   : > { %p114_p9 = scmp.eq.s32.totalorder %s663_s30, 2  ;;  %p120_p1 = scmp.eq.s32.totalorder %s664_s25, 2 }
  0x49   : > { %p1526_p4 = scmp.eq.s32.totalorder %s1142_s29, 0  ;;  %p1527_p0 = scmp.ne.s32.totalorder %s1520_s8, 0 }
  0x4a   : > { %p1353_p6 = por %p114_p9, %p82_p5  ;;  %p1357_p11 = por %p120_p1, %p88_p7 }
  0x4b   : > { %p84_p8 = por %p82_p5, %p1526_p4  ;;  %p1349_p3 = por %p88_p7, %p1527_p0 }
  0x4c   : > { %s1529_s16 = scalar_select %p1353_p6, 1, 0 }
  0x4d   : > { %s1530_s6 = scalar_select %p1357_p11, 1, 0 }
  0x4e   : > { %s164_s14 = sand.u32 1, %s1118_s24   ;;  %s715_s15 = sshll.u32 %s1138_s28, 10 }
  0x4f   : > { %s670_s30 = sshll.u32 %s164_s14, 6  ;;  %s1366_s11 = scalar_lea.hbm %s1512_s2, %s715_s15 }
  0x50   : > { %s168_s8 = scalar_lea.vmem [#allocation7], %s670_s30  ;;  %p1531_p2 = scmp.lt.s32.totalorder %s1142_s29, 3 }
  0x51   : > { %s175_s20 = sshll.u32 %s168_s8, 4  ;;  %s1376_s9 = scalar_lea.sflag [#allocation8], %s164_s14  ;;  %s1374_s20 = int_to_ptr.vmem [resolvable:$true] %s175_s20 }
  0x52   : > { %p1370_p12 = pnand %p1531_p2, %p84_p8  ;;  %s1000_s17 = scalar_lea.hbm %s1366_s11, 1024 }
  0x53   : > { %p1001_p13 = scmp.ne.s32.totalorder %s1366_s11, %s1000_s17  ;;  %s1005_s25 = scalar_lea.hbm %s1512_s2, 3072 }
  0x54   : > { %p1002_p10 = pneg %p1370_p12  ;;  %p1006_p9 = scmp.lt.u32.totalorder %s1366_s11, %s1512_s2 }
  0x55   : > { %p1007_p1 = scmp.lt.u32.totalorder %s1005_s25, %s1000_s17  ;;  %p1009_p8 = scmp.lt.u32.totalorder %s1000_s17, %s1366_s11 }
  0x56   : > { %p1003_p5 = pnand %p1002_p10, %p1001_p13 }
  0x57   : > { %p1008_p4 = por %p1007_p1, %p1006_p9 }
  0x58   : > { %p1004_p7 = pneg %p1003_p5 }
  0x59   : > { %p1010_p0 = por %p1009_p8, %p1008_p4 }
  0x5b   : > { %p1011_p2 = pnand %p1010_p0, %p1004_p7 }
  0x5d   : > { %1014 = shalt.err (!%p1011_p2)
}
  0x5e   : > { %s1015_s14 = scalar_lea.vmem %s1374_s20, 1024  ;;  %s1148_s15 = smov [#allocation7]  }
  0x5f   : > { %p1016_p13 = scmp.ne.s32.totalorder %s1374_s20, %s1015_s14  ;;  %s1020_s30 = sshll.u32 %s1148_s15, 4  ;;  %s1021_s30 = int_to_ptr.vmem [resolvable:$false] %s1020_s30 }
  0x60   : > { %s1022_s19 = scalar_lea.vmem %s1021_s30, 2048  ;;  %p1023_p6 = scmp.lt.s32.totalorder %s1374_s20, %s1021_s30 }
  0x61   : > { %p1018_p5 = pnand %p1016_p13, %p1002_p10  ;;  %p1024_p9 = scmp.lt.s32.totalorder %s1022_s19, %s1015_s14 }
  0x63   : > { %p1019_p11 = pneg %p1018_p5  ;;  %p1025_p1 = por %p1024_p9, %p1023_p6 }
  0x65   : > { %p1026_p4 = pnand %p1025_p1, %p1019_p11 }
  0x67   : > { %1029 = shalt.err (!%p1026_p4)
}
  0x68   : > { %s1533_s17 = smov 64   ;;  %p1534_p10 = scmp.ne.s32.totalorder %s1524_s21, 0 }
  0x69   : > { %860 = dma.hbm_to_vmem [thread:$0]  (!%p1370_p12), %s1366_s11, 1024, %s1374_s20, %s1376_s9, %s1533_s17, %s1533_s17, %s1147_s7  }
  0x6a   : > { %187 = sbr.rel (%p1534_p10) target bundleno = 391 (0x187), region = 28  ;;  %s189_s25 = sand.u32 (!%p1534_p10), 1, %s1126_s26  }
  0x6b   : > { %s674_s8 = sshll.u32 (!%p1534_p10), %s189_s25, 6  ;;  %s190_s14 = scalar_lea.sflag (!%p1534_p10), [#allocation5], %s189_s25 }
  0x6c   : > { %s1410_s15 = scalar_lea.vmem (!%p1534_p10), [#allocation4], %s674_s8  ;;  %p1535_p6 = scmp.ne.s32.totalorder (!%p1534_p10), %s1522_s10, 0 }
  0x71   : > { %1097 = dma.done.wait (%p1535_p6), %s190_s14, 1024  }
  0x72   : > { %1099 = vsyncadd (%p1535_p6), %s190_s14, 4294966272  ;;  %s1417_s5 = sand.u32 1, %s1114_s23  }
  0x73   : > { %s675_s21 = sshll.u32 %s1417_s5, 6  ;;  %s199_s7 = scalar_lea.sflag [#allocation8], %s1417_s5 }
  0x74   : > { %s1423_s11 = scalar_lea.vmem [#allocation7], %s675_s21 }
  0x75   : > { %1101 = dma.done.wait (%p1349_p3), %s199_s7, 1024  }
  0x76   : > { %1103 = vsyncadd (%p1349_p3), %s199_s7, 4294966272  ;;  %v944_v0 = vld [vmem:[%s1423_s11] sm:$0xff]   ;;  %v945_v1 = vld [vmem:[%s1423_s11 + $0x8] sm:$0xff]   ;;  %s227_s10 = scalar_lea.vmem [#allocation9], %s675_s21  ;;  %s732_s20 = sshll.u32 %s1134_s27, 10 }
  0x77   : > { %796 = vmatprep.subr.bf16.mxu0 %v944_v0  ;;  %828 = vmatprep.subr.bf16.mxu1 %v944_v0  ;;  %v946_v2 = vld [vmem:[%s1423_s11 + $0x10] sm:$0xff]   ;;  %v947_v3 = vld [vmem:[%s1423_s11 + $0x18] sm:$0xff]   ;;  %v952_v4 = vld [vmem:[%s1410_s15] sm:$0xff]   ;;  %s553_s13 = sshll.u32 %s227_s10, 4  ;;  %s1453_s19 = scalar_lea.hbm %s1513_s3, %s732_s20  ;;  %s1448_s13 = int_to_ptr.vmem [resolvable:$true] %s553_s13 }
  0x78   : > { %797 = vmatpush3.bf16.msra.mxu0 %v944_v0  ;;  %836 = vmatpush3.bf16.msra.mxu1 %v944_v0  ;;  %v953_v5 = vld [vmem:[%s1410_s15 + $0x20] sm:$0xff]   ;;  %v949_v7 = vld [vmem:[%s1423_s11 + $0x28] sm:$0xff]   ;;  %v950_v8 = vld [vmem:[%s1423_s11 + $0x30] sm:$0xff]   ;;  %s538_s27 = scalar_lea.sflag [#allocation6], %s1417_s5  ;;  %s1030_s17 = scalar_lea.vmem %s1448_s13, 1024 }
  0x79   : > { %798 = vmatprep.subr.bf16.mxu0 %v945_v1  ;;  %829 = vmatprep.subr.bf16.mxu1 %v945_v1  ;;  %v948_v6 = vld [vmem:[%s1423_s11 + $0x20] sm:$0xff]   ;;  %v951_v9 = vld [vmem:[%s1423_s11 + $0x38] sm:$0xff]   ;;  %v954_v10 = vld [vmem:[%s1410_s15 + $0x8] sm:$0xff]   ;;  %p1031_p3 = scmp.ne.s32.totalorder %s1448_s13, %s1030_s17  ;;  %p1536_p11 = scmp.ne.s32.totalorder %s1529_s16, 0 }
  0x7a   : > { %812 = vmatprep.mubr.bf16.mxu0 %v952_v4  ;;  %820 = vmatprep.mubr.bf16.mxu1 %v953_v5  ;;  %v955_v11 = vld [vmem:[%s1410_s15 + $0x28] sm:$0xff]   ;;  %v956_v12 = vld [vmem:[%s1410_s15 + $0x10] sm:$0xff]   ;;  %v958_v14 = vld [vmem:[%s1410_s15 + $0x18] sm:$0xff]   ;;  %s1149_s25 = smov [#allocation9]  }
  0x7b   : > { %v957_v13 = vld [vmem:[%s1410_s15 + $0x30] sm:$0xff]   ;;  %v959_v15 = vld [vmem:[%s1410_s15 + $0x38] sm:$0xff]   ;;  %p1032_p12 = pnand %p1031_p3, %p1536_p11  ;;  %s1034_s8 = sshll.u32 %s1149_s25, 4  ;;  %s1035_s8 = int_to_ptr.vmem [resolvable:$false] %s1034_s8 }
  0x7c   : > { %799 = vmatpush3.bf16.msra.mxu0 %v945_v1  ;;  %837 = vmatpush3.bf16.msra.mxu1 %v945_v1  ;;  %s1036_s14 = scalar_lea.vmem %s1035_s8, 2048  ;;  %p1037_p8 = scmp.lt.s32.totalorder %s1448_s13, %s1035_s8 }
  0x7d   : > { %800 = vmatprep.subr.bf16.mxu0 %v946_v2  ;;  %830 = vmatprep.subr.bf16.mxu1 %v946_v2  ;;  %p1033_p7 = pneg %p1032_p12  ;;  %p1038_p0 = scmp.lt.s32.totalorder %s1036_s14, %s1030_s17 }
  0x7f   : > { %p1039_p2 = por %p1038_p0, %p1037_p8 }
  0x80   : > { %801 = vmatpush3.bf16.msra.mxu0 %v946_v2  ;;  %838 = vmatpush3.bf16.msra.mxu1 %v946_v2 }
  0x81   : > { %802 = vmatprep.subr.bf16.mxu0 %v947_v3  ;;  %831 = vmatprep.subr.bf16.mxu1 %v947_v3  ;;  %p1040_p13 = pnand %p1039_p2, %p1033_p7 }
  0x84   : > { %803 = vmatpush3.bf16.msra.mxu0 %v947_v3  ;;  %839 = vmatpush3.bf16.msra.mxu1 %v947_v3 }
  0x85   : > { %804 = vmatprep.subr.bf16.mxu0 %v948_v6  ;;  %832 = vmatprep.subr.bf16.mxu1 %v948_v6 }
  0x88   : > { %805 = vmatpush3.bf16.msra.mxu0 %v948_v6  ;;  %840 = vmatpush3.bf16.msra.mxu1 %v948_v6 }
  0x89   : > { %806 = vmatprep.subr.bf16.mxu0 %v949_v7  ;;  %833 = vmatprep.subr.bf16.mxu1 %v949_v7 }
  0x8c   : > { %807 = vmatpush3.bf16.msra.mxu0 %v949_v7  ;;  %841 = vmatpush3.bf16.msra.mxu1 %v949_v7 }
  0x8d   : > { %808 = vmatprep.subr.bf16.mxu0 %v950_v8  ;;  %834 = vmatprep.subr.bf16.mxu1 %v950_v8 }
  0x90   : > { %809 = vmatpush3.bf16.msra.mxu0 %v950_v8  ;;  %842 = vmatpush3.bf16.msra.mxu1 %v950_v8 }
  0x91   : > { %810 = vmatprep.subr.bf16.mxu0 %v951_v9  ;;  %835 = vmatprep.subr.bf16.mxu1 %v951_v9 }
  0x94   : > { %811 = vmatpush3.bf16.msra.mxu0 %v951_v9  ;;  %843 = vmatpush3.bf16.msra.mxu1 %v951_v9 }
  0x97   : > { %813 = vmatmul.mubr.bf16.vlgmr.msra.gmra.mrb[0].mxu0 %v954_v10  ;;  %821 = vmatmul.mubr.bf16.vlgmr.msra.gmra.mrb[0].mxu1 %v955_v11 }
  0x98   : > { %816 = vmatprep.mubr.bf16.mxu0 %v956_v12  ;;  %824 = vmatprep.mubr.bf16.mxu1 %v957_v13 }
  0x9f   : > { %817 = vmatmul.mubr.bf16.gmra.mrb[4].mxu0 %v958_v14  ;;  %825 = vmatmul.mubr.bf16.gmra.mrb[4].mxu1 %v959_v15 }
 0x16a   : > { %v814_v16 = vpop.f32.mrb[0].mxu0  ;;  %v822_v17 = vpop.f32.mrb[0].mxu1 }
 0x16b   : > { %v394_v18 = vpop.f32.mrb[1].mxu0  ;;  %v426_v19 = vpop.f32.mrb[1].mxu1 }
 0x16c   : > { %v815_v20 = vpop.f32.mrb[2].mxu0  ;;  %v823_v21 = vpop.f32.mrb[2].mxu1 }
 0x16d   : > { %v741_v22 = vpack.c.bf16 %v815_v20, %v814_v16  ;;  %v761_v23 = vpack.c.bf16 %v823_v21, %v822_v17  ;;  %v397_v24 = vpop.f32.mrb[3].mxu0  ;;  %v429_v25 = vpop.f32.mrb[3].mxu1 }
 0x16e   : > { %v736_v26 = vpack.c.bf16 %v397_v24, %v394_v18  ;;  %v756_v27 = vpack.c.bf16 %v429_v25, %v426_v19 }
 0x16f   : > { %773 = vst [vmem:[%s227_s10 + $0x8] sm:$0xff] %v741_v22   ;;  %777 = vst [vmem:[%s227_s10 + $0x28] sm:$0xff] %v761_v23  }
 0x170   : > { %737 = vst [vmem:[%s227_s10] sm:$0xff] %v736_v26   ;;  %776 = vst [vmem:[%s227_s10 + $0x20] sm:$0xff] %v756_v27  }
 0x172   : > { %v818_v28 = vpop.f32.mrb[4].mxu0  ;;  %v826_v29 = vpop.f32.mrb[4].mxu1 }
 0x173   : > { %v410_v30 = vpop.f32.mrb[5].mxu0  ;;  %v442_v31 = vpop.f32.mrb[5].mxu1 }
 0x174   : > { %v819_v32 = vpop.f32.mrb[6].mxu0  ;;  %v827_v33 = vpop.f32.mrb[6].mxu1 }
 0x175   : > { %v751_v34 = vpack.c.bf16 %v819_v32, %v818_v28  ;;  %v771_v35 = vpack.c.bf16 %v827_v33, %v826_v29  ;;  %v413_v36 = vpop.f32.mrb[7].mxu0  ;;  %v445_v37 = vpop.f32.mrb[7].mxu1 }
 0x176   : > { %v746_v38 = vpack.c.bf16 %v413_v36, %v410_v30  ;;  %v766_v39 = vpack.c.bf16 %v445_v37, %v442_v31 }
 0x177   : > { %775 = vst [vmem:[%s227_s10 + $0x18] sm:$0xff] %v751_v34   ;;  %779 = vst [vmem:[%s227_s10 + $0x38] sm:$0xff] %v771_v35  }
 0x178   : > { %774 = vst [vmem:[%s227_s10 + $0x10] sm:$0xff] %v746_v38   ;;  %778 = vst [vmem:[%s227_s10 + $0x30] sm:$0xff] %v766_v39  }
 0x179   : > { %1043 = shalt.err (!%p1040_p13)
}
 0x17a   : > { %s1044_s15 = scalar_lea.hbm %s1453_s19, 1024  ;;  %s1048_s11 = scalar_lea.hbm %s1513_s3, 3072 }
 0x17b   : > { %p1045_p5 = scmp.ne.s32.totalorder %s1453_s19, %s1044_s15  ;;  %p1049_p4 = scmp.lt.u32.totalorder %s1453_s19, %s1513_s3 }
 0x17c   : > { %p1050_p10 = scmp.lt.u32.totalorder %s1048_s11, %s1044_s15  ;;  %p1052_p3 = scmp.lt.u32.totalorder %s1044_s15, %s1453_s19 }
 0x17d   : > { %p1046_p9 = pnand %p1045_p5, %p1536_p11 }
 0x17e   : > { %p1051_p6 = por %p1050_p10, %p1049_p4 }
 0x17f   : > { %p1047_p1 = pneg %p1046_p9 }
 0x180   : > { %p1053_p12 = por %p1052_p3, %p1051_p6 }
 0x182   : > { %p1054_p7 = pnand %p1053_p12, %p1047_p1 }
 0x184   : > { %1057 = shalt.err (!%p1054_p7)
}
 0x185   : > { %s1150_s9 = smov 64   ;;  %s1151_s30 = smov 4  }
 0x186   : > { %850 = dma.vmem_to_hbm [thread:$0]  (%p1536_p11), %s1448_s13, 1024, %s1453_s19, %s538_s27, %s1150_s9, %s1150_s9, %s1151_s30  }
 0x187 PF: > { %p866_p8 = scmp.ge.s32.totalorder %s1142_s29, 2  ;;  %s568_s17 = sand.u32 1, %s1110_s22  }
 0x188   : > { %p1537_p0 = scmp.ne.s32.totalorder %s1530_s6, 0  ;;  %s569_s25 = scalar_lea.sflag [#allocation6], %s568_s17 }
 0x18a   : > { %p862_p2 = pnand %p866_p8, %p1537_p0 }
 0x18c   : > { %1105 = dma.done.wait (!%p862_p2), %s569_s25, 1024  }
 0x18d   : > { %1107 = vsyncadd (!%p862_p2), %s569_s25, 4294966272  ;;  %s26_s29 = sadd.s32 1, %s1142_s29   ;;  %s1538_s22 = smov %s1114_s23 }
 0x18e   : > { %p23_p13 = scmp.ge.s32.totalorder %s26_s29, 5   ;;  %s1539_s23 = smov %s1118_s24 }
 0x18f   : > { %s1540_s24 = smov %s1335_s12  ;;  %s1541_s25 = smov %s1126_s26 }
 0x190   : > { %s1542_s26 = smov %s1130_s0  ;;  %s1543_s0 = smov %s1271_s18 }
 0x191   : > { %s1544_s27 = smov %s1138_s28  ;;  %s1545_s28 = smov %s1547_s4 }
 0x192   :  { %25 = sbr.rel (!%p23_p13) target bundleno = 22 (0x16), region = 86 }
 0x199   :  { %574 = vsyncpa [#allocation5], 1 }
 0x19a   :  { %576 = vsyncpa [#allocation5 + $0x1], 1 }
 0x19b   :  { %577 = vsyncpa [#allocation8], 1 }
 0x19c   :  { %579 = vsyncpa [#allocation8 + $0x1], 1 }
 0x19d   :  { %580 = vsyncpa [#allocation6], 1 }
 0x19e   :  { %582 = vsyncpa [#allocation6 + $0x1], 1 }

</bundles_post_ra>
